<compile_context>
chip_gen: v6e
topology: v6e:2x2x1
jax: 0.10.0
libtpu: 0.0.40
codegen_flags: <defaults>
</compile_context>

<pallas_src>
import jax
import jax.numpy as jnp
from jax.experimental import pallas as pl
from jax.experimental.pallas import tpu as pltpu


def _round_up(x, m):
    return ((x + m - 1) // m) * m


def _tpu_vmem_budget():
    """Return (scoped-VMEM limit bytes, has_big_vmem) for the current TPU gen."""
    try:
        cap = pltpu.get_tpu_info().vmem_capacity_bytes
    except Exception:
        cap = 64 * 1024 * 1024  # conservative (v7x-sized) fallback
    if cap >= 96 * 1024 * 1024:          # v5e / v6e: 128 MiB physical VMEM
        return 100 * 1024 * 1024, True
    return 48 * 1024 * 1024, False       # v7x: 64 MiB per TensorCore


def _make_kernel(use_bias, activation, single_k):
    """Build the Pallas kernel body for a given config."""

    def _epilogue(out_f32, b_ref, o_ref):
        if use_bias:
            out_f32 = out_f32 + b_ref[...].astype(jnp.float32)
        if activation == "relu":
            out_f32 = jnp.maximum(out_f32, 0.0)
        elif activation == "leaky_relu":
            out_f32 = jnp.where(out_f32 >= 0.0, out_f32, 0.01 * out_f32)
        # activation is None -> identity
        o_ref[...] = out_f32.astype(o_ref.dtype)

    if single_k:
        # No reduction over K -> no accumulator scratch, no pl.when phases.
        def kernel(*refs):
            if use_bias:
                x_ref, w_ref, b_ref, o_ref = refs
            else:
                x_ref, w_ref, o_ref = refs
                b_ref = None
            out = jnp.dot(x_ref[...], w_ref[...],
                          preferred_element_type=jnp.float32)
            _epilogue(out, b_ref, o_ref)

        return kernel

    def kernel(*refs):
        if use_bias:
            x_ref, w_ref, b_ref, o_ref, acc_ref = refs
        else:
            x_ref, w_ref, o_ref, acc_ref = refs
            b_ref = None

        k = pl.program_id(2)

        @pl.when(k == 0)
        def _():
            acc_ref[...] = jnp.zeros_like(acc_ref)

        # x tile (tm, tk) @ w tile (tk, tn): straight MXU feed, no transpose.
        acc_ref[...] += jnp.dot(x_ref[...], w_ref[...],
                                preferred_element_type=jnp.float32)

        @pl.when(k == pl.num_programs(2) - 1)
        def _():
            _epilogue(acc_ref[...], b_ref, o_ref)

    return kernel


def fc_block(x, weight, bias=None, activation="relu", compute_dtype=None,
             _tk_cap=None):
    """Pallas equivalent of FCBlock.forward.

    x:      (B, in_features)
    weight: (out_features, in_features)   (PyTorch nn.Linear convention)
    bias:   (out_features,) or None
    activation: "relu" | "leaky_relu" | None
    compute_dtype: optional dtype (e.g. jnp.bfloat16) for the MXU inputs;
                   accumulation stays f32, output keeps x.dtype.
    _tk_cap: testing knob to force a smaller K tile (exercises the K-reduction
             accumulator path at small shapes).
    """
    B, K = x.shape
    N, K2 = weight.shape
    assert K == K2, "in_features mismatch"
    use_bias = bias is not None
    out_dtype = x.dtype

    vmem_limit, big_vmem = _tpu_vmem_budget()

    cdt = jnp.dtype(compute_dtype) if compute_dtype is not None else jnp.dtype(x.dtype)
    sub = {4: 8, 2: 16, 1: 32}.get(cdt.itemsize, 8)   # sublane packing

    K128 = _round_up(K, 128)
    N128 = _round_up(N, 128)
    lane_cap = 2048 if big_vmem else 1024

    if B <= 64:
        # GEMV-like path: x tile / accumulator are tiny, so stream W in the
        # biggest contiguous tiles the VMEM budget allows.
        tm = _round_up(B, sub)
        tk = min(2048, K128)
        tn = min(2048, N128)
    else:
        tm = min(512, _round_up(B, sub))
        tk = min(lane_cap, K128)
        tn = min(lane_cap, N128)

    if _tk_cap is not None:
        tk = max(128, min(tk, _round_up(_tk_cap, 128)))

    Mp = _round_up(B, tm)
    # Keep both v7x TensorCores busy: if both parallel axes would be a single
    # block, split N into >= 2 blocks (harmless on v5e/v6e).
    if (Mp // tm) == 1 and tn >= N128 and N128 >= 256:
        tn = _round_up((N128 + 1) // 2, 128)

    Kp = _round_up(K, tk)
    Np = _round_up(N, tn)
    single_k = (Kp == tk)

    # One-time cast (bf16 MXU path) + one-time transpose of W to (K, N):
    # lane-major RHS layout feeds the MXU without per-K-step XLU transposes.
    x_c = x.astype(cdt)
    w_t = weight.T.astype(cdt)

    # Zero-pad only when shapes are not tile-aligned (no-op for aligned layers;
    # constant-folded under jit when weight/bias are constants).
    xp = x_c if (Mp == B and Kp == K) else jnp.pad(x_c, ((0, Mp - B), (0, Kp - K)))
    wp = w_t if (Kp == K and Np == N) else jnp.pad(w_t, ((0, Kp - K), (0, Np - N)))

    args = [xp, wp]
    if use_bias:
        bp = bias.reshape(1, N)
        if Np != N:
            bp = jnp.pad(bp, ((0, 0), (0, Np - N)))
        args.append(bp)

    if single_k:
        grid = (Mp // tm, Np // tn)
        in_specs = [
            pl.BlockSpec((tm, tk), lambda i, j: (i, 0)),   # x  (M, K)
            pl.BlockSpec((tk, tn), lambda i, j: (0, j)),   # W^T (K, N)
        ]
        if use_bias:
            in_specs.append(pl.BlockSpec((1, tn), lambda i, j: (0, j)))
        out_specs = pl.BlockSpec((tm, tn), lambda i, j: (i, j))
        scratch_shapes = []
        dims = ("parallel", "parallel")
    else:
        grid = (Mp // tm, Np // tn, Kp // tk)
        in_specs = [
            pl.BlockSpec((tm, tk), lambda i, j, k: (i, k)),   # x  (M, K)
            pl.BlockSpec((tk, tn), lambda i, j, k: (k, j)),   # W^T (K, N)
        ]
        if use_bias:
            in_specs.append(pl.BlockSpec((1, tn), lambda i, j, k: (0, j)))
        out_specs = pl.BlockSpec((tm, tn), lambda i, j, k: (i, j))
        scratch_shapes = [pltpu.VMEM((tm, tn), jnp.float32)]
        dims = ("parallel", "parallel", "arbitrary")

    bytes_accessed = (
        xp.size * xp.dtype.itemsize
        + wp.size * wp.dtype.itemsize
        + (args[2].size * args[2].dtype.itemsize if use_bias else 0)
        + Mp * Np * jnp.dtype(out_dtype).itemsize
    )
    cost = pl.CostEstimate(flops=2 * Mp * Np * Kp, transcendentals=0,
                           bytes_accessed=bytes_accessed)

    out = pl.pallas_call(
        _make_kernel(use_bias, activation, single_k),
        out_shape=jax.ShapeDtypeStruct((Mp, Np), out_dtype),
        grid=grid,
        in_specs=in_specs,
        out_specs=out_specs,
        scratch_shapes=scratch_shapes,
        compiler_params=pltpu.CompilerParams(
            dimension_semantics=dims,
            vmem_limit_bytes=vmem_limit,
        ),
        cost_estimate=cost,
    )(*args)

    if Mp != B or Np != N:
        out = out[:B, :N]
    return out


if __name__ == "__main__":
    key = jax.random.PRNGKey(0)
    k_x, k_w, k_b, k_x2, k_w2 = jax.random.split(key, 5)

    batch = 8
    in_channel = 32
    out_channel = 64

    x = jax.random.normal(k_x, (batch, in_channel), dtype=jnp.float32)
    # nn.Linear-shaped synthetic parameters: W (out, in), b (out,)
    bound = 1.0 / (in_channel ** 0.5)
    weight = jax.random.uniform(
        k_w, (out_channel, in_channel), minval=-bound, maxval=bound, dtype=jnp.float32
    )
    bias = jax.random.uniform(
        k_b, (out_channel,), minval=-bound, maxval=bound, dtype=jnp.float32
    )

    # 1) FCBlock with acti_layer=nn.ReLU (single-K fast path)
    out = jax.block_until_ready(fc_block(x, weight, bias, activation="relu"))
    ref = jnp.maximum(x @ weight.T + bias, 0.0)
    assert out.shape == (batch, out_channel)
    assert jnp.allclose(out, ref, atol=1e-5, rtol=1e-5), "mismatch (relu)"

    # 2) LeakyReLU path
    out_l = jax.block_until_ready(fc_block(x, weight, bias, activation="leaky_relu"))
    y = x @ weight.T + bias
    ref_l = jnp.where(y >= 0.0, y, 0.01 * y)
    assert jnp.allclose(out_l, ref_l, atol=1e-5, rtol=1e-5), "mismatch (leaky_relu)"

    # 3) No bias / no activation path
    out2 = jax.block_until_ready(fc_block(x, weight, bias=None, activation=None))
    ref2 = x @ weight.T
    assert jnp.allclose(out2, ref2, atol=1e-5, rtol=1e-5), "mismatch (no bias)"

    # 4) Multi-K accumulator path (force tk=128 so K=256 takes 2 reduction steps)
    K2 = 256
    x_big = jax.random.normal(k_x2, (batch, K2), dtype=jnp.float32)
    bound2 = 1.0 / (K2 ** 0.5)
    w_big = jax.random.uniform(
        k_w2, (out_channel, K2), minval=-bound2, maxval=bound2, dtype=jnp.float32
    )
    out3 = jax.block_until_ready(
        fc_block(x_big, w_big, bias, activation="relu", _tk_cap=128)
    )
    ref3 = jnp.maximum(x_big @ w_big.T + bias, 0.0)
    assert jnp.allclose(out3, ref3, atol=1e-4, rtol=1e-4), "mismatch (multi-K)"

    # 5) bf16 MXU path (f32 accumulation, loose tolerance for input rounding)
    out4 = jax.block_until_ready(
        fc_block(x, weight, bias, activation="relu", compute_dtype=jnp.bfloat16)
    )
    assert jnp.allclose(out4, ref, atol=5e-2, rtol=5e-2), "mismatch (bf16)"

    print("KERNEL_OK")
</pallas_src>

<mosaic_0001>
module attributes {stable_mosaic.version = 11 : i64} {
  func.func @kernel(%arg0: i32, %arg1: i32, %arg2: memref<8x128xf32, #tpu.memory_space<vmem>>, %arg3: memref<128x128xf32, #tpu.memory_space<vmem>>, %arg4: memref<1x128xf32, #tpu.memory_space<vmem>>, %arg5: memref<8x128xf32, #tpu.memory_space<vmem>>) attributes {dimension_semantics = [#tpu.dimension_semantics<parallel>, #tpu.dimension_semantics<parallel>], iteration_bounds = array<i64: 1, 1>, scalar_prefetch = 0 : i64, scratch_operands = 0 : i64, tpu.core_type = #tpu.core_type<tc>, window_params = [{transform_indices = @transform_0, window_bounds = array<i64: 8, 128>}, {transform_indices = @transform_1, window_bounds = array<i64: 128, 128>}, {transform_indices = @transform_2, window_bounds = array<i64: 1, 128>}, {transform_indices = @transform_3, window_bounds = array<i64: 8, 128>}]} {
    %c0 = arith.constant 0 : index
    %c0_0 = arith.constant 0 : index
    %0 = vector.load %arg2[%c0, %c0_0] : memref<8x128xf32, #tpu.memory_space<vmem>>, vector<8x128xf32>
    %c0_1 = arith.constant 0 : index
    %c0_2 = arith.constant 0 : index
    %1 = vector.load %arg3[%c0_1, %c0_2] : memref<128x128xf32, #tpu.memory_space<vmem>>, vector<128x128xf32>
    %cst = arith.constant dense<0.000000e+00> : vector<8x128xf32>
    %2 = tpu.matmul %0, %1, %cst {dimension_numbers = #tpu.dot_dimension_numbers<[1], [0], [0], [1], [0, 0, 1, 1], [], []>} : vector<8x128xf32>, vector<128x128xf32>, vector<8x128xf32> -> vector<8x128xf32>
    %c0_3 = arith.constant 0 : index
    %c0_4 = arith.constant 0 : index
    %3 = vector.load %arg4[%c0_3, %c0_4] : memref<1x128xf32, #tpu.memory_space<vmem>>, vector<1x128xf32>
    %4 = vector.broadcast %3 : vector<1x128xf32> to vector<8x128xf32>
    %5 = arith.addf %2, %4 : vector<8x128xf32>
    %cst_5 = arith.constant 0.000000e+00 : f32
    %6 = vector.broadcast %cst_5 : f32 to vector<8x128xf32>
    %7 = arith.maximumf %5, %6 : vector<8x128xf32>
    %c0_6 = arith.constant 0 : index
    %c0_7 = arith.constant 0 : index
    %8 = vector.load %arg5[%c0_6, %c0_7] : memref<8x128xf32, #tpu.memory_space<vmem>>, vector<8x128xf32>
    tpu.vector_store %arg5[%c0_6, %c0_7], %7 {strides = array<i32>} : memref<8x128xf32, #tpu.memory_space<vmem>>, vector<8x128xf32>,
    return
  }
  func.func @transform_0(%arg0: i32, %arg1: i32) -> (i32, i32) {
    %c0_i32 = arith.constant 0 : i32
    %c0_i32_0 = arith.constant 0 : i32
    return %arg0, %c0_i32 : i32, i32
  }
  func.func @transform_1(%arg0: i32, %arg1: i32) -> (i32, i32) {
    %c0_i32 = arith.constant 0 : i32
    %c0_i32_0 = arith.constant 0 : i32
    return %c0_i32, %arg1 : i32, i32
  }
  func.func @transform_2(%arg0: i32, %arg1: i32) -> (i32, i32) {
    %c0_i32 = arith.constant 0 : i32
    %c0_i32_0 = arith.constant 0 : i32
    return %c0_i32, %arg1 : i32, i32
  }
  func.func @transform_3(%arg0: i32, %arg1: i32) -> (i32, i32) {
    %c0_i32 = arith.constant 0 : i32
    return %arg0, %arg1 : i32, i32
  }
}

</mosaic_0001>

<bundles_post_ra>
// kernel: tpu_custom_call.1
= control target key start
LH: loop header
LB: loop body
LE: loop exit
PB: predicated region body
PF: predicated region fallthrough
CT: control target
= control target key end

     0   :  { %8 = vsyncpa [#allocation3], 0  ;;  %s318_s0 = inlined_call_operand.hbm [shape: f32[8,128], index: 0, kind: input, shape index: {}]   ;;  %s319_s1 = inlined_call_operand.hbm [shape: f32[128,128], index: 1, kind: input, shape index: {}]   ;;  %s320_s2 = inlined_call_operand.vmem [shape: f32[1,128], index: 2, kind: input, shape index: {}]   ;;  %s321_s3 = inlined_call_operand.hbm [shape: f32[8,128], index: 3, kind: output, shape index: {}]  }
   0x1   :  { %9 = vsyncpa [#allocation6], 0 }
   0x2   :  { %10 = vsyncpa [#allocation4], 0  ;;  %s279_s12 = smov [#allocation2]   ;;  %s280_s14 = smov [#allocation5]  }
   0x3   :  { %s17_s13 = sshll.u32 %s279_s12, 4  ;;  %s26_s15 = sshll.u32 %s280_s14, 4  ;;  %s18_s13 = int_to_ptr.vmem [resolvable:$true] %s17_s13  ;;  %s27_s15 = int_to_ptr.vmem [resolvable:$true] %s26_s15 }
   0x4   :  { %s221_s16 = scalar_lea.vmem %s18_s13, 128  ;;  %p226_p1 = scmp.lt.s32.totalorder %s18_s13, %s18_s13 }
   0x5   :  { %p222_p0 = scmp.ne.s32.totalorder %s18_s13, %s221_s16  ;;  %p227_p2 = scmp.lt.s32.totalorder %s221_s16, %s221_s16 }
   0x7   :  { %p228_p3 = por %p227_p2, %p226_p1 }
   0x9   :  { %p229_p4 = pnand %p228_p3, %p222_p0 }
   0xb   :  { %232 = shalt.err (!%p229_p4)
}
   0xc   :  { %20 = dma.hbm_to_vmem [thread:$0]  %s318_s0, 128, %s18_s13, [#allocation3]  }
   0xd   :  { %s241_s19 = scalar_lea.vmem %s27_s15, 2048  ;;  %p246_p6 = scmp.lt.s32.totalorder %s27_s15, %s27_s15 }
   0xe   :  { %p242_p5 = scmp.ne.s32.totalorder %s27_s15, %s241_s19  ;;  %p247_p7 = scmp.lt.s32.totalorder %s241_s19, %s241_s19 }
  0x10   :  { %p248_p8 = por %p247_p7, %p246_p6 }
  0x12   :  { %p249_p9 = pnand %p248_p8, %p242_p5 }
  0x14   :  { %252 = shalt.err (!%p249_p9)
}
  0x15   :  { %s281_s20 = smov 128   ;;  %s282_s21 = smov 8  }
  0x16   :  { %32 = dma.hbm_to_vmem [thread:$0]  %s319_s1, 2048, %s27_s15, [#allocation6], %s281_s20, %s281_s20, %s282_s21  }
  0x17   :  { %273 = dma.done.wait [#allocation3], 128  }
  0x18   :  { %274 = vsyncadd [#allocation3], 4294967168 }
  0x19   :  { %275 = dma.done.wait [#allocation6], 2048  }
  0x1a   :  { %276 = vsyncadd [#allocation6], 4294965248  ;;  %v283_v0 = vmov 0.0   ;;  %vm284_vm0 = vmmov 0   ;;  %v57_v1 = vld [vmem:[#allocation5 + $0x78] sm:$0xff]  ;;  %v56_v2 = vld [vmem:[#allocation5 + $0x70] sm:$0xff] }
  0x1b   :  { %171 = vmatprep.subr.mxu0 %v283_v0  ;;  %203 = vmatprep.mubr.msk.f32.mxu0 %vm284_vm0, %v283_v0  ;;  %v55_v3 = vld [vmem:[#allocation5 + $0x68] sm:$0xff]  ;;  %v54_v4 = vld [vmem:[#allocation5 + $0x60] sm:$0xff]  ;;  %v53_v5 = vld [vmem:[#allocation5 + $0x58] sm:$0xff]  ;;  %s285_s24 = smov [#allocation7]  }
  0x1c   :  { %172 = vmatpush3.msra.mxu0 %v57_v1  ;;  %v52_v6 = vld [vmem:[#allocation5 + $0x50] sm:$0xff]  ;;  %v51_v7 = vld [vmem:[#allocation5 + $0x48] sm:$0xff]  ;;  %v50_v8 = vld [vmem:[#allocation5 + $0x40] sm:$0xff]  ;;  %s143_s25 = sshll.u32 %s285_s24, 4  ;;  %s144_s25 = int_to_ptr.vmem [resolvable:$true] %s143_s25 }
  0x1d   :  { %173 = vmatprep.subr.mxu0 %v283_v0  ;;  %v49_v9 = vld [vmem:[#allocation5 + $0x38] sm:$0xff]  ;;  %v48_v10 = vld [vmem:[#allocation5 + $0x30] sm:$0xff]  ;;  %v47_v11 = vld [vmem:[#allocation5 + $0x28] sm:$0xff]  ;;  %s253_s26 = scalar_lea.vmem %s144_s25, 128  ;;  %p258_p11 = scmp.lt.s32.totalorder %s144_s25, %s144_s25 }
  0x1e   :  { %174 = vmatpush3.msra.mxu0 %v56_v2  ;;  %v46_v12 = vld [vmem:[#allocation5 + $0x20] sm:$0xff]  ;;  %v45_v13 = vld [vmem:[#allocation5 + $0x18] sm:$0xff]  ;;  %v44_v14 = vld [vmem:[#allocation5 + $0x10] sm:$0xff]  ;;  %p254_p10 = scmp.ne.s32.totalorder %s144_s25, %s253_s26  ;;  %p259_p12 = scmp.lt.s32.totalorder %s253_s26, %s253_s26 }
  0x1f   :  { %175 = vmatprep.subr.mxu0 %v283_v0  ;;  %v43_v15 = vld [vmem:[#allocation5 + $0x8] sm:$0xff]  ;;  %v42_v16 = vld [vmem:[#allocation5] sm:$0xff]  ;;  %v41_v17 = vld [vmem:[#allocation2] sm:$0xff] }
  0x20   :  { %176 = vmatpush3.msra.mxu0 %v55_v3  ;;  %v153_v18 = vld [vmem:[%s320_s2] ss:$0 sm:$0xff]  ;;  %p260_p13 = por %p259_p12, %p258_p11 }
  0x21   :  { %177 = vmatprep.subr.mxu0 %v283_v0 }
  0x22   :  { %178 = vmatpush3.msra.mxu0 %v54_v4  ;;  %p261_p0 = pnand %p260_p13, %p254_p10 }
  0x23   :  { %179 = vmatprep.subr.mxu0 %v283_v0 }
  0x24   :  { %180 = vmatpush3.msra.mxu0 %v53_v5 }
  0x25   :  { %181 = vmatprep.subr.mxu0 %v283_v0 }
  0x26   :  { %182 = vmatpush3.msra.mxu0 %v52_v6 }
  0x27   :  { %183 = vmatprep.subr.mxu0 %v283_v0 }
  0x28   :  { %184 = vmatpush3.msra.mxu0 %v51_v7 }
  0x29   :  { %185 = vmatprep.subr.mxu0 %v283_v0 }
  0x2a   :  { %186 = vmatpush3.msra.mxu0 %v50_v8 }
  0x2b   :  { %187 = vmatprep.subr.mxu0 %v283_v0 }
  0x2c   :  { %188 = vmatpush3.msra.mxu0 %v49_v9 }
  0x2d   :  { %189 = vmatprep.subr.mxu0 %v283_v0 }
  0x2e   :  { %190 = vmatpush3.msra.mxu0 %v48_v10 }
  0x2f   :  { %191 = vmatprep.subr.mxu0 %v283_v0 }
  0x30   :  { %192 = vmatpush3.msra.mxu0 %v47_v11 }
  0x31   :  { %193 = vmatprep.subr.mxu0 %v283_v0 }
  0x32   :  { %194 = vmatpush3.msra.mxu0 %v46_v12 }
  0x33   :  { %195 = vmatprep.subr.mxu0 %v283_v0 }
  0x34   :  { %196 = vmatpush3.msra.mxu0 %v45_v13 }
  0x35   :  { %197 = vmatprep.subr.mxu0 %v283_v0 }
  0x36   :  { %198 = vmatpush3.msra.mxu0 %v44_v14 }
  0x37   :  { %199 = vmatprep.subr.mxu0 %v283_v0 }
  0x38   :  { %200 = vmatpush3.msra.mxu0 %v43_v15 }
  0x39   :  { %201 = vmatprep.subr.mxu0 %v283_v0 }
  0x3a   :  { %202 = vmatpush3.msra.mxu0 %v42_v16 }
  0x3b   :  { %204 = vmatmul.mubr.f32.vlgmr.msra.gmra.mxu0 %v41_v17 }
  0xfb   :  { %v131_v19 = vpop.f32.mrf.mxu0 }
  0xfc   :  { %v132_v20 = vadd.f32 %v153_v18, %v131_v19 }
  0xfd   :  { %v205_v21 = vpop.f32.mrf.mxu0 }
  0xfe   :  { %v135_v22 = vmax.f32 %v132_v20, 0.0 }
 0x100   :  { %136 = vst [vmem:[#allocation7] sm:$0xff] %v135_v22 }
 0x101   :  { %264 = shalt.err (!%p261_p0)
}
 0x102   :  { %146 = dma.vmem_to_hbm [thread:$0]  %s144_s25, 128, %s321_s3, [#allocation4]  }
 0x103   :  { %277 = dma.done.wait [#allocation4], 128  }
 0x104   :  { %278 = vsyncadd [#allocation4], 4294967168 }
 0x105   :  { %150 = vsyncpa [#allocation3], 1 }
 0x106   :  { %151 = vsyncpa [#allocation6], 1 }
 0x107   :  { %152 = vsyncpa [#allocation4], 1 }

</bundles_post_ra>
